<compile_context>
chip_gen: v5e
topology: v5e:2x2
jax: 0.10.0
libtpu: 0.0.40
codegen_flags: <defaults>
</compile_context>

<pallas_src>
import jax
import jax.numpy as jnp
from jax import lax
from jax.experimental import pallas as pl
from jax.experimental.pallas import tpu as pltpu

# ---- config (mirrors the PyTorch `args` class) ----
VOCAB_SIZE = 22
EMBED_DIM = 16          # gen_small_embedding
CNN_HIDDEN = 16         # cnn_hidden_size
OUT_DIM = 2 * CNN_HIDDEN
MAX_LEN = 35            # gen_max_len
PAD_ID = 21             # pad_token_id
LN_EPS = 1e-12          # layer_norm_eps


def ab_embeddings_kernel(src_ref, tri_ref, comb_ref, w_ref, b_ref, out_ref):
    src = src_ref[...]                                    # [TB, Lp] int32, Lp % 8 == 0
    TB, Lp = src.shape
    VP, E = comb_ref.shape                                # VP = VOCAB_SIZE + MAX_LEN
    OUT = w_ref.shape[1]
    out_L = out_ref.shape[1]                              # logical (unpadded) seq length
    rows = TB * Lp

    # --- position ids: per-sequence inclusive cumsum of the non-pad mask,
    #     expressed as an MXU matmul with the hoisted upper-triangular matrix.
    #     0/1 mask and counts <= Lp are exact in bf16-in / f32-accumulate. ---
    mask = src != PAD_ID                                  # [TB, Lp] bool
    csum = jnp.dot(mask.astype(jnp.bfloat16), tri_ref[...],
                   preferred_element_type=jnp.float32)    # [TB, Lp] exact integers
    pid = jnp.where(mask, csum.astype(jnp.int32), 0)
    # Clamp: a row with zero padding reaches position MAX_LEN which has no table
    # row; clamp to the last row (matches the jnp reference's gather clamping).
    pid = jnp.minimum(pid, MAX_LEN - 1)

    # --- fused token + position lookup: ONE combined one-hot [rows, V+P] and ONE
    #     long-M 2-D MXU matmul against the concatenated table -> aa[src]+pos[pid].
    #     The reshape only collapses major dims (Lp % 8 == 0), so it is layout-free.
    #     NOTE: assumes 0 <= src < VOCAB_SIZE; an out-of-range id would silently
    #     alias a positional column instead of erroring like torch.nn.Embedding.
    vp_iota = lax.broadcasted_iota(jnp.int32, (TB, Lp, VP), 2)
    hit = (src[:, :, None] == vp_iota) | ((pid + VOCAB_SIZE)[:, :, None] == vp_iota)
    onehot = hit.astype(jnp.float32).reshape(rows, VP)
    emb = jnp.dot(onehot, comb_ref[...],
                  preferred_element_type=jnp.float32)     # [rows, E]

    # --- LayerNorm over the feature dim (affine folded into w_ref/b_ref) ---
    mean = jnp.mean(emb, axis=-1, keepdims=True)
    cent = emb - mean
    var = jnp.mean(cent * cent, axis=-1, keepdims=True)
    normed = cent * lax.rsqrt(var + LN_EPS)

    # TODO(synk): Dropout is identity here (deterministic / eval mode).

    # --- UpEmbedding with gamma folded into W and (beta @ W + bias) as b ---
    up = jnp.dot(normed, w_ref[...],
                 preferred_element_type=jnp.float32) + b_ref[...]     # [rows, OUT]
    res = up.reshape(TB, Lp, OUT)                         # layout-free major-dim split
    out_ref[...] = res[:, :out_L, :] if out_L != Lp else res


def _pick_batch_tile(B: int, Lp: int, target_rows: int = 4096) -> int:
    """Sequences per grid step.  Large tiles amortize the ~0.35us/step grid
    overhead (~4096 rows/step; ~3 KB of padded VMEM per row keeps this well
    under the 32 MiB default scoped VMEM).  When B allows, keep >= 8 grid steps
    so v7x's two TensorCores both get work and pipelining stays deep.  The tile
    must divide B and be either == B or a multiple of 8 (sublane blocking)."""
    if B <= 8:
        return B
    cap = min(max(1, target_rows // Lp),    # rows/step target
              max(1, B // 8))               # keep >= 8 steps when possible
    if cap >= B:
        return B
    best = None
    tb = 8
    while tb <= cap:
        if B % tb == 0:
            best = tb
        tb += 8
    return best if best is not None else B


def ab_embeddings(src, aa_table, pos_table, ln_gamma, ln_beta, up_w, up_b):
    """src: [B, L] int32 token ids.  `length` from the PyTorch forward is unused
    there, so it is not taken here.  Returns [B, L, 2*cnn_hidden] float32."""
    B, L = src.shape
    V, E = aa_table.shape
    P = pos_table.shape[0]
    OUT = up_w.shape[1]

    # Pad the sequence dim to a sublane multiple so the in-kernel flatten of the
    # one-hot / activations is layout-free.  Extra columns are PAD tokens (their
    # rows produce b_fold and are never written to the output block).
    Lp = ((L + 7) // 8) * 8
    src_p = src.astype(jnp.int32)
    if Lp != L:
        src_p = jnp.pad(src_p, ((0, 0), (0, Lp - L)), constant_values=PAD_ID)

    # ---- parameter-only folds (tiny, constant-foldable under jit) ----
    comb = jnp.concatenate([aa_table, pos_table], axis=0).astype(jnp.float32)   # [V+P, E]
    w_fold = (ln_gamma.reshape(E, 1) * up_w).astype(jnp.float32)                # [E, OUT]
    b_fold = (ln_beta.reshape(1, E) @ up_w + up_b.reshape(1, OUT)).astype(jnp.float32)
    idx = jnp.arange(Lp)
    tri = (idx[:, None] <= idx[None, :]).astype(jnp.bfloat16)                   # [Lp, Lp]

    TB = _pick_batch_tile(B, Lp)
    grid = (B // TB,)

    cost = pl.CostEstimate(
        flops=2 * B * Lp * ((V + P) * E + E * OUT + Lp),
        transcendentals=B * Lp,                                        # rsqrt per row
        bytes_accessed=(B * Lp * 4 + B * L * OUT * 4
                        + ((V + P) * E + E * OUT + OUT + Lp * Lp) * 4),
    )

    return pl.pallas_call(
        ab_embeddings_kernel,
        out_shape=jax.ShapeDtypeStruct((B, L, OUT), jnp.float32),
        grid=grid,
        in_specs=[
            pl.BlockSpec((TB, Lp), lambda i: (i, 0)),         # src tile
            pl.BlockSpec((Lp, Lp), lambda i: (0, 0)),         # hoisted triangular matrix
            pl.BlockSpec((V + P, E), lambda i: (0, 0)),       # combined table (resident)
            pl.BlockSpec((E, OUT), lambda i: (0, 0)),         # folded up-proj weight
            pl.BlockSpec((1, OUT), lambda i: (0, 0)),         # folded bias
        ],
        out_specs=pl.BlockSpec((TB, L, OUT), lambda i: (i, 0, 0)),
        compiler_params=pltpu.CompilerParams(
            dimension_semantics=("parallel",)),               # shards over 2 TCs on v7x
        cost_estimate=cost,
    )(src_p, tri, comb, w_fold, b_fold)


def ab_embeddings_ref(src, aa_table, pos_table, ln_gamma, ln_beta, up_w, up_b):
    """Pure-JAX reference mirroring the PyTorch forward with ORIGINAL (unfolded)
    parameters (dropout = identity)."""
    inputs_embeds = aa_table[src]                                       # [B, L, E]
    mask = (src != PAD_ID).astype(jnp.int32)
    pid = jnp.cumsum(mask, axis=1) * mask
    pid = jnp.minimum(pid, pos_table.shape[0] - 1)
    pos_embeds = pos_table[pid]
    emb = inputs_embeds + pos_embeds
    mean = jnp.mean(emb, axis=-1, keepdims=True)
    var = jnp.mean((emb - mean) ** 2, axis=-1, keepdims=True)
    normed = (emb - mean) / jnp.sqrt(var + LN_EPS)
    normed = normed * ln_gamma + ln_beta
    return normed @ up_w + up_b


if __name__ == "__main__":
    key = jax.random.PRNGKey(0)
    k_src, k_aa, k_pos, k_g, k_be, k_w, k_b = jax.random.split(key, 7)

    B, L = 2, MAX_LEN

    # token ids with trailing padding
    src = jax.random.randint(k_src, (B, L), 0, VOCAB_SIZE - 1, dtype=jnp.int32)
    src = src.at[0, 28:].set(PAD_ID)
    src = src.at[1, 20:].set(PAD_ID)
    length = jnp.array([28, 20], dtype=jnp.int32)  # unused by forward (matches PyTorch)

    # deterministic parameter init (padding rows zeroed, as nn.Embedding does)
    aa_table = (0.02 * jax.random.normal(k_aa, (VOCAB_SIZE, EMBED_DIM))).astype(jnp.float32)
    aa_table = aa_table.at[PAD_ID].set(0.0)
    pos_table = (0.02 * jax.random.normal(k_pos, (MAX_LEN, EMBED_DIM))).astype(jnp.float32)
    pos_table = pos_table.at[0].set(0.0)
    # non-trivial LayerNorm affine so the wrapper-side fold is actually exercised
    ln_gamma = (1.0 + 0.1 * jax.random.normal(k_g, (EMBED_DIM,))).astype(jnp.float32)
    ln_beta = (0.05 * jax.random.normal(k_be, (EMBED_DIM,))).astype(jnp.float32)
    # stored as [in, out] == transposed PyTorch nn.Linear weight
    up_w = (0.1 * jax.random.normal(k_w, (EMBED_DIM, OUT_DIM))).astype(jnp.float32)
    up_b = (0.01 * jax.random.normal(k_b, (OUT_DIM,))).astype(jnp.float32)

    out = ab_embeddings(src, aa_table, pos_table, ln_gamma, ln_beta, up_w, up_b)
    out = jax.block_until_ready(out)

    ref = ab_embeddings_ref(src, aa_table, pos_table, ln_gamma, ln_beta, up_w, up_b)
    assert out.shape == (B, L, OUT_DIM), out.shape
    err = float(jnp.max(jnp.abs(out - ref)))
    assert jnp.allclose(out, ref, atol=1e-5, rtol=1e-5), err

    print("KERNEL_OK")
</pallas_src>

<mosaic_0001>
module attributes {stable_mosaic.version = 11 : i64} {
  func.func @ab_embeddings_kernel(%arg0: i32, %arg1: memref<2x40xi32, #tpu.memory_space<vmem>>, %arg2: memref<40x40xbf16, #tpu.memory_space<vmem>>, %arg3: memref<57x16xf32, #tpu.memory_space<vmem>>, %arg4: memref<16x32xf32, #tpu.memory_space<vmem>>, %arg5: memref<1x32xf32, #tpu.memory_space<vmem>>, %arg6: memref<2x35x32xf32, #tpu.memory_space<vmem>>) attributes {dimension_semantics = [#tpu.dimension_semantics<parallel>], iteration_bounds = array<i64: 1>, scalar_prefetch = 0 : i64, scratch_operands = 0 : i64, tpu.core_type = #tpu.core_type<tc>, window_params = [{transform_indices = @transform_0, window_bounds = array<i64: 2, 40>}, {pipeline_mode = #tpu.pipeline_mode<synchronous>, transform_indices = @transform_1, window_bounds = array<i64: 40, 40>}, {pipeline_mode = #tpu.pipeline_mode<synchronous>, transform_indices = @transform_2, window_bounds = array<i64: 57, 16>}, {pipeline_mode = #tpu.pipeline_mode<synchronous>, transform_indices = @transform_3, window_bounds = array<i64: 16, 32>}, {pipeline_mode = #tpu.pipeline_mode<synchronous>, transform_indices = @transform_4, window_bounds = array<i64: 1, 32>}, {transform_indices = @transform_5, window_bounds = array<i64: 2, 35, 32>}]} {
    %c0 = arith.constant 0 : index
    %c0_0 = arith.constant 0 : index
    %0 = vector.load %arg1[%c0, %c0_0] : memref<2x40xi32, #tpu.memory_space<vmem>>, vector<2x40xi32>
    %c21_i32 = arith.constant 21 : i32
    %1 = vector.broadcast %c21_i32 : i32 to vector<2x40xi32>
    %2 = arith.cmpi ne, %0, %1 : vector<2x40xi32>
    %3 = arith.extui %2 : vector<2x40xi1> to vector<2x40xi32>
    %4 = arith.sitofp %3 : vector<2x40xi32> to vector<2x40xf32>
    %5 = arith.truncf %4 : vector<2x40xf32> to vector<2x40xbf16>
    %c0_1 = arith.constant 0 : index
    %c0_2 = arith.constant 0 : index
    %6 = vector.load %arg2[%c0_1, %c0_2] : memref<40x40xbf16, #tpu.memory_space<vmem>>, vector<40x40xbf16>
    %cst = arith.constant dense<0.000000e+00> : vector<2x40xf32>
    %7 = tpu.matmul %5, %6, %cst {dimension_numbers = #tpu.dot_dimension_numbers<[1], [0], [0], [1], [0, 0, 1, 1], [], []>} : vector<2x40xbf16>, vector<40x40xbf16>, vector<2x40xf32> -> vector<2x40xf32>
    %8 = arith.fptosi %7 : vector<2x40xf32> to vector<2x40xi32>
    %c0_i32 = arith.constant 0 : i32
    %9 = vector.broadcast %c0_i32 : i32 to vector<2x40xi32>
    %10 = arith.select %2, %8, %9 : vector<2x40xi1>, vector<2x40xi32>
    %c34_i32 = arith.constant 34 : i32
    %11 = vector.broadcast %c34_i32 : i32 to vector<2x40xi32>
    %12 = arith.minsi %10, %11 : vector<2x40xi32>
    %13 = tpu.iota {dimensions = array<i32: 2>} : vector<2x40x57xi32>
    %14 = vector.shape_cast %0 : vector<2x40xi32> to vector<2x40x1xi32>
    %15 = vector.broadcast %14 : vector<2x40x1xi32> to vector<2x40x57xi32>
    %16 = arith.cmpi eq, %15, %13 : vector<2x40x57xi32>
    %c22_i32 = arith.constant 22 : i32
    %17 = vector.broadcast %c22_i32 : i32 to vector<2x40xi32>
    %18 = arith.addi %12, %17 : vector<2x40xi32>
    %19 = vector.shape_cast %18 : vector<2x40xi32> to vector<2x40x1xi32>
    %20 = vector.broadcast %19 : vector<2x40x1xi32> to vector<2x40x57xi32>
    %21 = arith.cmpi eq, %20, %13 : vector<2x40x57xi32>
    %22 = arith.ori %16, %21 : vector<2x40x57xi1>
    %23 = arith.extui %22 : vector<2x40x57xi1> to vector<2x40x57xi32>
    %24 = arith.sitofp %23 : vector<2x40x57xi32> to vector<2x40x57xf32>
    %25 = vector.shape_cast %24 : vector<2x40x57xf32> to vector<80x57xf32>
    %c0_3 = arith.constant 0 : index
    %c0_4 = arith.constant 0 : index
    %26 = vector.load %arg3[%c0_3, %c0_4] : memref<57x16xf32, #tpu.memory_space<vmem>>, vector<57x16xf32>
    %cst_5 = arith.constant dense<0.000000e+00> : vector<80x16xf32>
    %27 = tpu.matmul %25, %26, %cst_5 {dimension_numbers = #tpu.dot_dimension_numbers<[1], [0], [0], [1], [0, 0, 1, 1], [], []>} : vector<80x57xf32>, vector<57x16xf32>, vector<80x16xf32> -> vector<80x16xf32>
    %cst_6 = arith.constant dense<0.000000e+00> : vector<80xf32>
    %28 = vector.multi_reduction <add>, %27, %cst_6 [1] : vector<80x16xf32> to vector<80xf32>
    %29 = vector.shape_cast %28 : vector<80xf32> to vector<80x1xf32>
    %cst_7 = arith.constant 1.600000e+01 : f32
    %30 = vector.broadcast %cst_7 : f32 to vector<80x1xf32>
    %31 = arith.divf %29, %30 : vector<80x1xf32>
    %32 = vector.broadcast %31 : vector<80x1xf32> to vector<80x16xf32>
    %33 = arith.subf %27, %32 : vector<80x16xf32>
    %34 = arith.mulf %33, %33 : vector<80x16xf32>
    %cst_8 = arith.constant dense<0.000000e+00> : vector<80xf32>
    %35 = vector.multi_reduction <add>, %34, %cst_8 [1] : vector<80x16xf32> to vector<80xf32>
    %36 = vector.shape_cast %35 : vector<80xf32> to vector<80x1xf32>
    %cst_9 = arith.constant 1.600000e+01 : f32
    %37 = vector.broadcast %cst_9 : f32 to vector<80x1xf32>
    %38 = arith.divf %36, %37 : vector<80x1xf32>
    %cst_10 = arith.constant 9.99999996E-13 : f32
    %39 = vector.broadcast %cst_10 : f32 to vector<80x1xf32>
    %40 = arith.addf %38, %39 : vector<80x1xf32>
    %41 = math.rsqrt %40 : vector<80x1xf32>
    %42 = vector.broadcast %41 : vector<80x1xf32> to vector<80x16xf32>
    %43 = arith.mulf %33, %42 : vector<80x16xf32>
    %c0_11 = arith.constant 0 : index
    %c0_12 = arith.constant 0 : index
    %44 = vector.load %arg4[%c0_11, %c0_12] : memref<16x32xf32, #tpu.memory_space<vmem>>, vector<16x32xf32>
    %cst_13 = arith.constant dense<0.000000e+00> : vector<80x32xf32>
    %45 = tpu.matmul %43, %44, %cst_13 {dimension_numbers = #tpu.dot_dimension_numbers<[1], [0], [0], [1], [0, 0, 1, 1], [], []>} : vector<80x16xf32>, vector<16x32xf32>, vector<80x32xf32> -> vector<80x32xf32>
    %c0_14 = arith.constant 0 : index
    %c0_15 = arith.constant 0 : index
    %46 = vector.load %arg5[%c0_14, %c0_15] : memref<1x32xf32, #tpu.memory_space<vmem>>, vector<1x32xf32>
    %47 = vector.broadcast %46 : vector<1x32xf32> to vector<80x32xf32>
    %48 = arith.addf %45, %47 : vector<80x32xf32>
    %49 = vector.shape_cast %48 : vector<80x32xf32> to vector<2x40x32xf32>
    %50 = vector.extract_strided_slice %49 {offsets = [0, 0, 0], sizes = [2, 35, 32], strides = [1, 1, 1]} : vector<2x40x32xf32> to vector<2x35x32xf32>
    %c0_16 = arith.constant 0 : index
    %c0_17 = arith.constant 0 : index
    %c0_18 = arith.constant 0 : index
    %51 = vector.load %arg6[%c0_16, %c0_17, %c0_18] : memref<2x35x32xf32, #tpu.memory_space<vmem>>, vector<2x35x32xf32>
    tpu.vector_store %arg6[%c0_16, %c0_17, %c0_18], %50 {strides = array<i32>} : memref<2x35x32xf32, #tpu.memory_space<vmem>>, vector<2x35x32xf32>,
    return
  }
  func.func @transform_0(%arg0: i32) -> (i32, i32) {
    %c0_i32 = arith.constant 0 : i32
    %c0_i32_0 = arith.constant 0 : i32
    return %arg0, %c0_i32 : i32, i32
  }
  func.func @transform_1(%arg0: i32) -> (i32, i32) {
    %c0_i32 = arith.constant 0 : i32
    %c0_i32_0 = arith.constant 0 : i32
    %c0_i32_1 = arith.constant 0 : i32
    return %c0_i32, %c0_i32_0 : i32, i32
  }
  func.func @transform_2(%arg0: i32) -> (i32, i32) {
    %c0_i32 = arith.constant 0 : i32
    %c0_i32_0 = arith.constant 0 : i32
    %c0_i32_1 = arith.constant 0 : i32
    return %c0_i32, %c0_i32_0 : i32, i32
  }
  func.func @transform_3(%arg0: i32) -> (i32, i32) {
    %c0_i32 = arith.constant 0 : i32
    %c0_i32_0 = arith.constant 0 : i32
    %c0_i32_1 = arith.constant 0 : i32
    return %c0_i32, %c0_i32_0 : i32, i32
  }
  func.func @transform_4(%arg0: i32) -> (i32, i32) {
    %c0_i32 = arith.constant 0 : i32
    %c0_i32_0 = arith.constant 0 : i32
    %c0_i32_1 = arith.constant 0 : i32
    return %c0_i32, %c0_i32_0 : i32, i32
  }
  func.func @transform_5(%arg0: i32) -> (i32, i32, i32) {
    %c0_i32 = arith.constant 0 : i32
    %c0_i32_0 = arith.constant 0 : i32
    %c0_i32_1 = arith.constant 0 : i32
    return %arg0, %c0_i32, %c0_i32_0 : i32, i32, i32
  }
}

</mosaic_0001>

<bundles_post_ra>
// kernel: tpu_custom_call.1
= control target key start
LH: loop header
LB: loop body
LE: loop exit
PB: predicated region body
PF: predicated region fallthrough
CT: control target
= control target key end

     0   :  { %v71_v0 = vlaneseq  ;;  %vm50_vm0 = vcmask 1043456   ;;  %v766_v12 = vmov 0.0   ;;  %vm46_vm2 = vcmask 326656   ;;  %s1048_s1 = inlined_call_operand.vmem [shape: bf16[40,40], index: 1, kind: input, shape index: {}]   ;;  %s1049_s0 = inlined_call_operand.vmem [shape: s32[2,40], index: 0, kind: input, shape index: {}]   ;;  %s1050_s2 = inlined_call_operand.vmem [shape: f32[57,16], index: 2, kind: input, shape index: {}]   ;;  %s1051_s4 = inlined_call_operand.vmem [shape: f32[1,32], index: 4, kind: input, shape index: {}]   ;;  %s1052_s3 = inlined_call_operand.vmem [shape: f32[16,32], index: 3, kind: input, shape index: {}]   ;;  %s1053_s5 = inlined_call_operand.vmem [shape: f32[2,35,32], index: 5, kind: output, shape index: {}]  }
   0x1   :  { %v30_v1 = vld [vmem:[%s1048_s1 + $0x10] sm:$0xf]  ;;  %v21_v7 = vld [vmem:[%s1049_s0] sm:$0x3]  ;;  %v707_v9 = vld [vmem:[%s1048_s1 + $0x8] sm:$0xff]  ;;  %vm287_vm5 = vcmask 1040384  }
   0x2   :  { %v40_v2 = vunpack.c.l.b16 %v30_v1  ;;  %v75_v3 = vshrl.u32 %v71_v0, 7  ;;  %vm22_vm1 = vcmp.ne.s32.totalorder %v21_v7, 21  ;;  %v73_v10 = vperm.slane %v21_v7, 0  ;;  %v706_v11 = vld [vmem:[%s1048_s1] sm:$0xff]  ;;  %v255_v29 = vld [vmem:[%s1050_s2 + $0x38] sm:$0x1] }
   0x3   :  { %v665_v13 = vsel %vm22_vm1, 1.0, %v766_v12  ;;  %v104_v27 = vperm.slane %v21_v7, 1  ;;  %v254_v30 = vld [vmem:[%s1050_s2 + $0x30] sm:$0xff]  ;;  %685 = vmatpush.msk.msra.mxu1 %vm287_vm5, %v255_v29  ;;  %708 = vmatpush.msk.msra.mxu3 %vm287_vm5, %v255_v29  ;;  %v253_v31 = vld [vmem:[%s1050_s2 + $0x28] sm:$0xff]  ;;  %v252_v32 = vld [vmem:[%s1050_s2 + $0x20] sm:$0xff]  ;;  %v839_v39 = vand.u32 127, %v71_v0 }
   0x4   :  { %v43_v4 = vpack.c.b16 %v40_v2, %v40_v2  ;;  %725 = vset.pattern.permute.xlu0 %v75_v3  ;;  %v88_v5 = vadd.s32 16, %v75_v3  ;;  %v82_v6 = vadd.s32 8, %v75_v3  ;;  %v25_v14 = vpack.c.bf16 %v665_v13, %v665_v13  ;;  %v251_v33 = vld [vmem:[%s1050_s2 + $0x18] sm:$0xff]  ;;  %v250_v34 = vld [vmem:[%s1050_s2 + $0x10] sm:$0xff]  ;;  %v249_v35 = vld [vmem:[%s1050_s2 + $0x8] sm:$0xff] }
   0x5   :  { %v100_v25 = vadd.s32 32, %v75_v3  ;;  %v94_v26 = vadd.s32 24, %v75_v3  ;;  %300 = vmatpush.msra.mxu1 %v254_v30  ;;  %709 = vmatpush.msra.mxu3 %v254_v30  ;;  %v248_v36 = vld [vmem:[%s1050_s2] sm:$0xff]  ;;  %vm256_vm8 = vcmask 465920  }
   0x6   :  { %v52_v8 = vsel %vm50_vm0, %v43_v4, 0  ;;  %727 = vset.pattern.permute.xlu2 %v88_v5  ;;  %726 = vset.pattern.permute.xlu1 %v82_v6 }
   0x7   :  { %59 = vmatpush.bf16.msra.mxu0 %v52_v8  ;;  %301 = vmatpush.msra.mxu1 %v253_v31 }
   0x8   :  { %710 = vmatpush.msra.mxu3 %v253_v31 }
   0x9   :  { %302 = vmatpush.msra.mxu1 %v252_v32 }
   0xa   :  { %711 = vmatpush.msra.mxu3 %v252_v32 }
   0xb   :  { %60 = vmatpush.bf16.msra.mxu0 %v707_v9  ;;  %303 = vmatpush.msra.mxu1 %v251_v33 }
   0xc   :  { %78 = vperm.xlu0 %725, %v73_v10   ;;  %712 = vmatpush.msra.mxu3 %v251_v33 }
   0xd   :  { %304 = vmatpush.msra.mxu1 %v250_v34 }
   0xe   :  { %90 = vperm.xlu2 %727, %v73_v10   ;;  %84 = vperm.xlu1 %726, %v73_v10  }
   0xf   :  { %61 = vmatpush.bf16.msra.mxu0 %v706_v11  ;;  %713 = vmatpush.msra.mxu3 %v250_v34 }
  0x10   :  { %305 = vmatpush.msra.mxu1 %v249_v35 }
  0x11   :  { %714 = vmatpush.msra.mxu3 %v249_v35 }
  0x12   :  { %674 = vmatmul.msk.bf16.vlgmr.msra.gmra.mxu0 %vm46_vm2, %v25_v14  ;;  %306 = vmatpush.msra.mxu1 %v248_v36 }
  0x13   :  { %715 = vmatpush.msra.mxu3 %v248_v36 }
  0x68   :  { %v91_v40 = vpop.permute.xlu2 %90 }
  0x69   :  { %vm137_vm13 = vcmp.eq.s32.totalorder %v91_v40, %v839_v39 }
  0x7e   :  { %v79_v37 = vpop.permute.xlu0 %78 }
  0x7f   :  { %vm135_vm6 = vcmp.eq.s32.totalorder %v79_v37, %v839_v39 }
  0x80   :  { %v85_v38 = vpop.permute.xlu1 %84 }
  0x81   :  { %vm136_vm11 = vcmp.eq.s32.totalorder %v85_v38, %v839_v39 }
  0x8f   :  { %v63_v15 = vpop.f32.mrf.mxu0 }
  0x90   :  { %vm718_vm3 = vcmp.lt.s32.totalorder %v63_v15, 0  ;;  %v719_v16 = vceil.f32 %v63_v15  ;;  %v720_v17 = vfloor.f32 %v63_v15 }
  0x92   :  { %v721_v18 = vsel %vm718_vm3, %v719_v16, %v720_v17 }
  0x93   :  { %v722_v19 = vcvt.f32.s32 %v721_v18 }
  0x95   :  { %v68_v20 = vsel %vm22_vm1, %v722_v19, 0 }
  0x96   :  { %vm69_vm4 = vcmp.lt.s32.totalorder %v68_v20, 34 }
  0x97   :  { %v70_v21 = vsel %vm69_vm4, %v68_v20, 34  ;;  %v65_v22 = vpop.f32.mrf.mxu0 }
  0x98   :  { %v145_v23 = vadd.s32 22, %v70_v21 }
  0x9a   :  { %v146_v24 = vperm.slane %v145_v23, 0  ;;  %v177_v28 = vperm.slane %v145_v23, 1 }
  0x9c   :  { %163 = vperm.xlu2 %727, %v146_v24   ;;  %157 = vperm.xlu1 %726, %v146_v24  }
  0x9d   :  { %151 = vperm.xlu0 %725, %v146_v24  }
  0xa4   :  { %729 = vset.pattern.permute.xlu2 %v100_v25  ;;  %730 = vset.pattern.permute.xlu1 %v94_v26 }
  0xa5   :  { %728 = vset.pattern.permute.xlu0 %v94_v26 }
  0xac   :  { %102 = vperm.xlu2 %729, %v73_v10   ;;  %169 = vperm.xlu1 %730, %v146_v24  }
  0xad   :  { %96 = vperm.xlu0 %728, %v73_v10  }
  0xb4   :  { %732 = vset.pattern.permute.xlu2 %v75_v3  ;;  %731 = vset.pattern.permute.xlu1 %v100_v25 }
  0xb5   :  { %733 = vset.pattern.permute.xlu0 %v75_v3 }
  0xbc   :  { %109 = vperm.xlu2 %732, %v104_v27   ;;  %175 = vperm.xlu1 %731, %v146_v24   ;;  %v767_v24 = vmov 16.0  }
  0xbd   :  { %182 = vperm.xlu0 %733, %v177_v28   ;;  %744 = vrcp.f32 %v767_v24 }
  0xc4   :  { %736 = vset.pattern.permute.xlu2 %v82_v6  ;;  %734 = vset.pattern.permute.xlu1 %v82_v6 }
  0xc5   :  { %738 = vset.pattern.permute.xlu0 %v94_v26 }
  0xcc   :  { %188 = vperm.xlu2 %736, %v177_v28   ;;  %115 = vperm.xlu1 %734, %v104_v27  }
  0xcd   :  { %127 = vperm.xlu0 %738, %v104_v27  }
  0xd4   :  { %737 = vset.pattern.permute.xlu2 %v88_v5  ;;  %735 = vset.pattern.permute.xlu1 %v88_v5 }
  0xd5   :  { %742 = vset.pattern.permute.xlu0 %v100_v25 }
  0xdc   :  { %194 = vperm.xlu2 %737, %v177_v28   ;;  %121 = vperm.xlu1 %735, %v104_v27  }
  0xe4   :  { %740 = vset.pattern.permute.xlu1 %v94_v26  ;;  %739 = vset.pattern.permute.xlu2 %v100_v25 }
  0xec   :  { %200 = vperm.xlu1 %740, %v177_v28   ;;  %133 = vperm.xlu2 %739, %v104_v27  }
  0xf4   :  { %741 = vset.pattern.permute.xlu1 %v100_v25  ;;  %v745_v25 = vpop.eup %744 }
  0xf5   :  { %v370_v26 = vmul.f32 16.0, %v745_v25 }
  0xf6   :  { %v164_v44 = vpop.permute.xlu2 %163 }
  0xf7   :  { %vm210_vm14 = vcmp.eq.s32.totalorder %v164_v44, %v839_v39  ;;  %v371_v27 = vsub.f32 1.0, %v370_v26 }
  0xf8   :  { %vm220_vm15 = vmor %vm137_vm13, %vm210_vm14 }
  0xf9   :  { %v677_v48 = vsel %vm220_vm15, 1.0, %v766_v12 }
  0xfc   :  { %206 = vperm.xlu1 %741, %v177_v28   ;;  %v372_v28 = vmul.f32 %v745_v25, %v371_v27 }
  0xfe   :  { %v373_v29 = vadd.f32 %v745_v25, %v372_v28 }
 0x106   :  { %v103_v49 = vpop.permute.xlu2 %102 }
 0x107   :  { %vm139_vm3 = vcmp.eq.s32.totalorder %v103_v49, %v839_v39 }
 0x10e   :  { %v158_v42 = vpop.permute.xlu1 %157 }
 0x10f   :  { %v152_v41 = vpop.permute.xlu0 %151  ;;  %vm209_vm10 = vcmp.eq.s32.totalorder %v158_v42, %v839_v39 }
 0x110   :  { %vm208_vm7 = vcmp.eq.s32.totalorder %v152_v41, %v839_v39  ;;  %vm219_vm12 = vmor %vm136_vm11, %vm209_vm10 }
 0x111   :  { %vm218_vm9 = vmor %vm135_vm6, %vm208_vm7  ;;  %v676_v45 = vsel %vm219_vm12, 1.0, %v766_v12 }
 0x112   :  { %v675_v43 = vsel %vm218_vm9, 1.0, %v766_v12 }
 0x113   :  { %686 = vmatmul.msk.f32.vlgmr.msra.gmra.mxu1 %vm256_vm8, %v675_v43 }
 0x116   :  { %v110_v51 = vpop.permute.xlu2 %109 }
 0x117   :  { %vm140_vm4 = vcmp.eq.s32.totalorder %v110_v51, %v839_v39 }
 0x11b   :  { %687 = vmatmul.msk.f32.gmra.mxu1 %vm256_vm8, %v676_v45 }
 0x11e   :  { %v170_v46 = vpop.permute.xlu1 %169 }
 0x11f   :  { %v97_v47 = vpop.permute.xlu0 %96  ;;  %vm211_vm0 = vcmp.eq.s32.totalorder %v170_v46, %v839_v39 }
 0x120   :  { %vm138_vm1 = vcmp.eq.s32.totalorder %v97_v47, %v839_v39 }
 0x121   :  { %vm221_vm2 = vmor %vm138_vm1, %vm211_vm0 }
 0x122   :  { %v678_v50 = vsel %vm221_vm2, 1.0, %v766_v12 }
 0x123   :  { %688 = vmatmul.msk.f32.gmra.mxu1 %vm256_vm8, %v677_v48 }
 0x126   :  { %v189_v56 = vpop.permute.xlu2 %188 }
 0x127   :  { %vm214_vm10 = vcmp.eq.s32.totalorder %v189_v56, %v839_v39 }
 0x12b   :  { %689 = vmatmul.msk.f32.gmra.mxu1 %vm256_vm8, %v678_v50 }
 0x12e   :  { %v176_v52 = vpop.permute.xlu1 %175 }
 0x12f   :  { %vm212_vm5 = vcmp.eq.s32.totalorder %v176_v52, %v839_v39  ;;  %v183_v53 = vpop.permute.xlu0 %182 }
 0x130   :  { %vm222_vm6 = vmor %vm139_vm3, %vm212_vm5  ;;  %vm213_vm7 = vcmp.eq.s32.totalorder %v183_v53, %v839_v39 }
 0x131   :  { %vm223_vm9 = vmor %vm140_vm4, %vm213_vm7  ;;  %v679_v54 = vsel %vm222_vm6, 1.0, %v766_v12  ;;  %vm338_vm6 = vcmask 130048  }
 0x132   :  { %v680_v55 = vsel %vm223_vm9, 1.0, %v766_v12 }
 0x133   :  { %690 = vmatmul.msk.f32.gmra.mxu1 %vm256_vm8, %v679_v54  ;;  %691 = vmatmul.msk.f32.vlgmr.msra.gmra.mxu3 %vm256_vm8, %v680_v55 }
 0x136   :  { %v195_v59 = vpop.permute.xlu2 %194 }
 0x137   :  { %vm215_vm13 = vcmp.eq.s32.totalorder %v195_v59, %v839_v39 }
 0x13e   :  { %v116_v57 = vpop.permute.xlu1 %115 }
 0x13f   :  { %vm141_vm11 = vcmp.eq.s32.totalorder %v116_v57, %v839_v39  ;;  %v128_v62 = vpop.permute.xlu0 %127 }
 0x140   :  { %vm224_vm12 = vmor %vm141_vm11, %vm214_vm10  ;;  %vm143_vm0 = vcmp.eq.s32.totalorder %v128_v62, %v839_v39 }
 0x141   :  { %v681_v58 = vsel %vm224_vm12, 1.0, %v766_v12 }
 0x142   :  { %692 = vmatmul.msk.f32.gmra.mxu3 %vm256_vm8, %v681_v58 }
 0x146   :  { %v134_v1 = vpop.permute.xlu2 %133 }
 0x147   :  { %vm144_vm3 = vcmp.eq.s32.totalorder %v134_v1, %v839_v39 }
 0x14e   :  { %v122_v60 = vpop.permute.xlu1 %121 }
 0x14f   :  { %vm142_vm14 = vcmp.eq.s32.totalorder %v122_v60, %v839_v39 }
 0x150   :  { %vm225_vm15 = vmor %vm142_vm14, %vm215_vm13 }
 0x151   :  { %v682_v61 = vsel %vm225_vm15, 1.0, %v766_v12 }
 0x152   :  { %693 = vmatmul.msk.f32.gmra.mxu3 %vm256_vm8, %v682_v61 }
 0x15e   :  { %v201_v63 = vpop.permute.xlu1 %200 }
 0x15f   :  { %vm216_vm1 = vcmp.eq.s32.totalorder %v201_v63, %v839_v39 }
 0x160   :  { %vm226_vm2 = vmor %vm143_vm0, %vm216_vm1 }
 0x161   :  { %v683_v0 = vsel %vm226_vm2, 1.0, %v766_v12 }
 0x162   :  { %694 = vmatmul.msk.f32.gmra.mxu3 %vm256_vm8, %v683_v0 }
 0x16e   :  { %v207_v2 = vpop.permute.xlu1 %206 }
 0x16f   :  { %vm217_vm4 = vcmp.eq.s32.totalorder %v207_v2, %v839_v39 }
 0x170   :  { %vm227_vm5 = vmor %vm144_vm3, %vm217_vm4 }
 0x171   :  { %v684_v3 = vsel %vm227_vm5, 1.0, %v766_v12 }
 0x172   :  { %695 = vmatmul.msk.f32.gmra.mxu3 %vm256_vm8, %v684_v3  ;;  %vm374_vm8 = vweird.f32 %v745_v25 }
 0x173   :  { %v903_v30 = vsel %vm374_vm8, %v745_v25, %v373_v29 }
 0x190   :  { %v308_v4 = vpop.f32.mrf.mxu1 }
 0x191   :  { %v339_v12 = vsel %vm338_vm6, %v308_v4, 0.0 }
 0x198   :  { %v881_v5 = vpop.f32.mrf.mxu1 }
 0x199   :  { %v342_v18 = vsel %vm338_vm6, %v881_v5, 0.0 }
 0x1a0   :  { %v883_v6 = vpop.f32.mrf.mxu1 }
 0x1a1   :  { %v345_v20 = vsel %vm338_vm6, %v883_v6, 0.0 }
 0x1a8   :  { %v317_v7 = vpop.f32.mrf.mxu1 }
 0x1a9   :  { %v348_v8 = vsel %vm338_vm6, %v317_v7, 0.0 }
 0x1aa   :  { %349 = vadd.xlane.f32.xlu2 %v348_v8 }
 0x1b0   :  { %v320_v9 = vpop.f32.mrf.mxu1 }
 0x1b1   :  { %v351_v10 = vsel %vm338_vm6, %v320_v9, 0.0 }
 0x1b2   :  { %352 = vadd.xlane.f32.xlu0 %v351_v10 }
 0x1b6   :  { %v323_v11 = vpop.f32.mrf.mxu3 }
 0x1b7   :  { %v354_v13 = vsel %vm338_vm6, %v323_v11, 0.0 }
 0x1b8   :  { %355 = vadd.xlane.f32.xlu1 %v354_v13 }
 0x1ba   :  { %340 = vadd.xlane.f32.xlu0 %v339_v12 }
 0x1c5   :  { %v326_v14 = vpop.f32.mrf.mxu3 }
 0x1c6   :  { %v357_v15 = vsel %vm338_vm6, %v326_v14, 0.0 }
 0x1c7   :  { %358 = vadd.xlane.f32.xlu2 %v357_v15 }
 0x1d5   :  { %v329_v16 = vpop.f32.mrf.mxu3 }
 0x1d6   :  { %v360_v17 = vsel %vm338_vm6, %v329_v16, 0.0 }
 0x1d7   :  { %361 = vadd.xlane.f32.xlu2 %v360_v17  ;;  %v567_v17 = vld [vmem:[%s1052_s3 + $0x8] sm:$0xff] }
 0x1d8   :  { %716 = vmatpush.msra.mxu2 %v567_v17  ;;  %616 = vmatpush.msrb.mxu0 %v567_v17 }
 0x1df   :  { %343 = vadd.xlane.f32.xlu2 %v342_v18  ;;  %v566_v18 = vld [vmem:[%s1052_s3] sm:$0xff] }
 0x1e0   :  { %717 = vmatpush.msra.mxu2 %v566_v18  ;;  %617 = vmatpush.msrb.mxu0 %v566_v18 }
 0x1e5   :  { %v893_v19 = vpop.f32.mrf.mxu3 }
 0x1e6   :  { %v363_v21 = vsel %vm338_vm6, %v893_v19, 0.0 }
 0x1e7   :  { %346 = vadd.xlane.f32.xlu2 %v345_v20  ;;  %364 = vadd.xlane.f32.xlu1 %v363_v21 }
 0x1f5   :  { %v899_v22 = vpop.f32.mrf.mxu3 }
 0x1f6   :  { %v366_v23 = vsel %vm338_vm6, %v899_v22, 0.0 }
 0x1f7   :  { %367 = vadd.xlane.f32.xlu1 %v366_v23 }
 0x21d   :  { %v350_v31 = vpop.xlane.xlu2 %349 }
 0x21e   :  { %v379_v32 = vmul.f32 %v903_v30, %v350_v31 }
 0x220   :  { %v906_v33 = vsub.f32 %v317_v7, %v379_v32 }
 0x222   :  { %v399_v34 = vmul.f32 %v906_v33, %v906_v33 }
 0x224   :  { %v415_v35 = vsel %vm338_vm6, %v399_v34, 0.0 }
 0x225   :  { %416 = vadd.xlane.f32.xlu0 %v415_v35  ;;  %v353_v36 = vpop.xlane.xlu0 %352 }
 0x226   :  { %v380_v37 = vmul.f32 %v903_v30, %v353_v36 }
 0x228   :  { %v912_v38 = vsub.f32 %v320_v9, %v380_v37 }
 0x22a   :  { %v400_v39 = vmul.f32 %v912_v38, %v912_v38 }
 0x22b   :  { %v356_v40 = vpop.xlane.xlu1 %355 }
 0x22c   :  { %v381_v41 = vmul.f32 %v903_v30, %v356_v40  ;;  %v418_v42 = vsel %vm338_vm6, %v400_v39, 0.0 }
 0x22d   :  { %419 = vadd.xlane.f32.xlu0 %v418_v42  ;;  %v341_v43 = vpop.xlane.xlu0 %340 }
 0x22e   :  { %v918_v44 = vsub.f32 %v323_v11, %v381_v41  ;;  %v376_v45 = vmul.f32 %v903_v30, %v341_v43 }
 0x230   :  { %v401_v46 = vmul.f32 %v918_v44, %v918_v44  ;;  %v923_v47 = vsub.f32 %v308_v4, %v376_v45 }
 0x232   :  { %v421_v48 = vsel %vm338_vm6, %v401_v46, 0.0  ;;  %v396_v49 = vmul.f32 %v923_v47, %v923_v47 }
 0x233   :  { %422 = vadd.xlane.f32.xlu1 %v421_v48 }
 0x234   :  { %v406_v51 = vsel %vm338_vm6, %v396_v49, 0.0 }
 0x23a   :  { %v359_v50 = vpop.xlane.xlu2 %358 }
 0x23b   :  { %v382_v52 = vmul.f32 %v903_v30, %v359_v50  ;;  %407 = vadd.xlane.f32.xlu1 %v406_v51 }
 0x23d   :  { %v930_v53 = vsub.f32 %v326_v14, %v382_v52 }
 0x23f   :  { %v402_v54 = vmul.f32 %v930_v53, %v930_v53 }
 0x241   :  { %v424_v55 = vsel %vm338_vm6, %v402_v54, 0.0 }
 0x242   :  { %425 = vadd.xlane.f32.xlu2 %v424_v55 }
 0x24a   :  { %v362_v56 = vpop.xlane.xlu2 %361 }
 0x24b   :  { %v383_v57 = vmul.f32 %v903_v30, %v362_v56 }
 0x24d   :  { %v936_v58 = vsub.f32 %v329_v16, %v383_v57 }
 0x24f   :  { %v403_v59 = vmul.f32 %v936_v58, %v936_v58 }
 0x251   :  { %v427_v60 = vsel %vm338_vm6, %v403_v59, 0.0 }
 0x252   :  { %v344_v61 = vpop.xlane.xlu2 %343  ;;  %428 = vadd.xlane.f32.xlu0 %v427_v60 }
 0x253   :  { %v377_v62 = vmul.f32 %v903_v30, %v344_v61 }
 0x255   :  { %v943_v63 = vsub.f32 %v881_v5, %v377_v62 }
 0x257   :  { %v397_v0 = vmul.f32 %v943_v63, %v943_v63 }
 0x259   :  { %v409_v1 = vsel %vm338_vm6, %v397_v0, 0.0 }
 0x25a   :  { %v347_v2 = vpop.xlane.xlu2 %346  ;;  %v365_v3 = vpop.xlane.xlu1 %364  ;;  %410 = vadd.xlane.f32.xlu0 %v409_v1 }
 0x25b   :  { %v384_v4 = vmul.f32 %v903_v30, %v365_v3  ;;  %v378_v7 = vmul.f32 %v903_v30, %v347_v2 }
 0x25d   :  { %v951_v8 = vsub.f32 %v893_v19, %v384_v4  ;;  %v956_v5 = vsub.f32 %v883_v6, %v378_v7 }
 0x25f   :  { %v404_v9 = vmul.f32 %v951_v8, %v951_v8  ;;  %v398_v11 = vmul.f32 %v956_v5, %v956_v5 }
 0x261   :  { %v430_v10 = vsel %vm338_vm6, %v404_v9, 0.0  ;;  %v412_v13 = vsel %vm338_vm6, %v398_v11, 0.0 }
 0x262   :  { %431 = vadd.xlane.f32.xlu2 %v430_v10 }
 0x26a   :  { %413 = vadd.xlane.f32.xlu2 %v412_v13  ;;  %v368_v12 = vpop.xlane.xlu1 %367 }
 0x26b   :  { %v385_v14 = vmul.f32 %v903_v30, %v368_v12 }
 0x26d   :  { %v964_v15 = vsub.f32 %v899_v22, %v385_v14 }
 0x26f   :  { %v405_v16 = vmul.f32 %v964_v15, %v964_v15 }
 0x271   :  { %v433_v6 = vsel %vm338_vm6, %v405_v16, 0.0 }
 0x272   :  { %434 = vadd.xlane.f32.xlu1 %v433_v6 }
 0x298   :  { %v417_v19 = vpop.xlane.xlu0 %416 }
 0x299   :  { %v439_v20 = vmul.f32 %v417_v19, %v903_v30 }
 0x29b   :  { %v449_v21 = vadd.f32 1e-12, %v439_v20 }
 0x29d   :  { %746 = vrsqrt.f32 %v449_v21  ;;  %vm492_vm9 = vweird.f32 %v449_v21 }
 0x2a0   :  { %v420_v22 = vpop.xlane.xlu0 %419 }
 0x2a1   :  { %v440_v23 = vmul.f32 %v420_v22, %v903_v30 }
 0x2a3   :  { %v747_v24 = vpop.eup %746  ;;  %v450_v25 = vadd.f32 1e-12, %v440_v23 }
 0x2a4   :  { %v487_v26 = vmul.f32 %v747_v24, %v449_v21  ;;  %vm493_vm7 = vweird.f32 %v747_v24 }
 0x2a5   :  { %748 = vrsqrt.f32 %v450_v25  ;;  %vm494_vm10 = vmor %vm492_vm9, %vm493_vm7  ;;  %vm502_vm12 = vweird.f32 %v450_v25 }
 0x2a6   :  { %v488_v27 = vmul.f32 %v747_v24, %v487_v26  ;;  %v423_v28 = vpop.xlane.xlu1 %422 }
 0x2a7   :  { %v441_v29 = vmul.f32 %v423_v28, %v903_v30 }
 0x2a8   :  { %v489_v31 = vmul.f32 0.5, %v488_v27 }
 0x2a9   :  { %v451_v32 = vadd.f32 1e-12, %v441_v29 }
 0x2aa   :  { %v490_v34 = vsub.f32 1.5, %v489_v31 }
 0x2ab   :  { %v749_v35 = vpop.eup %748  ;;  %750 = vrsqrt.f32 %v451_v32  ;;  %vm512_vm15 = vweird.f32 %v451_v32 }
 0x2ac   :  { %v497_v36 = vmul.f32 %v749_v35, %v450_v25  ;;  %v491_v37 = vmul.f32 %v747_v24, %v490_v34  ;;  %vm503_vm11 = vweird.f32 %v749_v35 }
 0x2ad   :  { %vm504_vm13 = vmor %vm502_vm12, %vm503_vm11 }
 0x2ae   :  { %v498_v39 = vmul.f32 %v749_v35, %v497_v36  ;;  %v408_v40 = vpop.xlane.xlu1 %407  ;;  %v495_v41 = vsel %vm494_vm10, %v747_v24, %v491_v37 }
 0x2af   :  { %v436_v42 = vmul.f32 %v408_v40, %v903_v30  ;;  %v559_v43 = vmul.f32 %v495_v41, %v906_v33 }
 0x2b0   :  { %v499_v45 = vmul.f32 0.5, %v498_v39 }
 0x2b1   :  { %v751_v46 = vpop.eup %750  ;;  %v446_v48 = vadd.f32 1e-12, %v436_v42  ;;  %699 = vmatmul.msk.f32.vlgmr.msra.gmra.mxu2 %vm338_vm6, %v559_v43 }
 0x2b2   :  { %v500_v49 = vsub.f32 1.5, %v499_v45  ;;  %v507_v50 = vmul.f32 %v751_v46, %v451_v32  ;;  %vm513_vm14 = vweird.f32 %v751_v46 }
 0x2b3   :  { %752 = vrsqrt.f32 %v446_v48  ;;  %vm514_vm0 = vmor %vm512_vm15, %vm513_vm14  ;;  %vm462_vm2 = vweird.f32 %v446_v48 }
 0x2b4   :  { %v508_v51 = vmul.f32 %v751_v46, %v507_v50  ;;  %v501_v52 = vmul.f32 %v749_v35, %v500_v49 }
 0x2b5   :  { %v426_v54 = vpop.xlane.xlu2 %425 }
 0x2b6   :  { %v509_v55 = vmul.f32 0.5, %v508_v51  ;;  %v442_v56 = vmul.f32 %v426_v54, %v903_v30  ;;  %v505_v57 = vsel %vm504_vm13, %v749_v35, %v501_v52 }
 0x2b7   :  { %v560_v33 = vmul.f32 %v505_v57, %v912_v38 }
 0x2b8   :  { %v510_v59 = vsub.f32 1.5, %v509_v55  ;;  %v452_v60 = vadd.f32 1e-12, %v442_v56 }
 0x2b9   :  { %v753_v61 = vpop.eup %752  ;;  %700 = vmatmul.msk.f32.gmra.mxu2 %vm338_vm6, %v560_v33 }
 0x2ba   :  { %v457_v62 = vmul.f32 %v753_v61, %v446_v48  ;;  %754 = vrsqrt.f32 %v452_v60  ;;  %v511_v0 = vmul.f32 %v751_v46, %v510_v59  ;;  %vm463_vm1 = vweird.f32 %v753_v61 }
 0x2bb   :  { %vm464_vm3 = vmor %vm462_vm2, %vm463_vm1  ;;  %vm522_vm5 = vweird.f32 %v452_v60 }
 0x2bc   :  { %v458_v1 = vmul.f32 %v753_v61, %v457_v62  ;;  %v515_v2 = vsel %vm514_vm0, %v751_v46, %v511_v0 }
 0x2bd   :  { %v561_v4 = vmul.f32 %v515_v2, %v918_v44 }
 0x2be   :  { %v459_v3 = vmul.f32 0.5, %v458_v1 }
 0x2c0   :  { %v755_v7 = vpop.eup %754  ;;  %v460_v9 = vsub.f32 1.5, %v459_v3 }
 0x2c1   :  { %v517_v38 = vmul.f32 %v755_v7, %v452_v60  ;;  %701 = vmatmul.msk.f32.gmra.mxu2 %vm338_vm6, %v561_v4  ;;  %vm523_vm4 = vweird.f32 %v755_v7 }
 0x2c2   :  { %v461_v10 = vmul.f32 %v753_v61, %v460_v9  ;;  %vm524_vm8 = vmor %vm522_vm5, %vm523_vm4 }
 0x2c3   :  { %v518_v11 = vmul.f32 %v755_v7, %v517_v38 }
 0x2c4   :  { %v465_v13 = vsel %vm464_vm3, %v753_v61, %v461_v10 }
 0x2c5   :  { %v519_v12 = vmul.f32 0.5, %v518_v11  ;;  %v429_v14 = vpop.xlane.xlu0 %428  ;;  %v556_v16 = vmul.f32 %v465_v13, %v923_v47  ;;  %v743_v13 = vld [vmem:[%s1051_s4] ss:$0 sm:$0xff] }
 0x2c6   :  { %v443_v6 = vmul.f32 %v429_v14, %v903_v30 }
 0x2c7   :  { %v520_v17 = vsub.f32 1.5, %v519_v12  ;;  %696 = vmatmul.msk.f32.vlgmr.msrb.gmra.mxu0 %vm338_vm6, %v556_v16 }
 0x2c8   :  { %v453_v44 = vadd.f32 1e-12, %v443_v6 }
 0x2c9   :  { %v521_v18 = vmul.f32 %v755_v7, %v520_v17 }
 0x2ca   :  { %756 = vrsqrt.f32 %v453_v44  ;;  %vm532_vm9 = vweird.f32 %v453_v44 }
 0x2cb   :  { %v525_v19 = vsel %vm524_vm8, %v755_v7, %v521_v18 }
 0x2cc   :  { %v562_v20 = vmul.f32 %v525_v19, %v930_v53 }
 0x2cd   :  { %v411_v21 = vpop.xlane.xlu0 %410 }
 0x2ce   :  { %v437_v22 = vmul.f32 %v411_v21, %v903_v30  ;;  %702 = vmatmul.msk.f32.gmra.mxu2 %vm338_vm6, %v562_v20 }
 0x2d0   :  { %v757_v47 = vpop.eup %756  ;;  %v447_v23 = vadd.f32 1e-12, %v437_v22 }
 0x2d1   :  { %v527_v24 = vmul.f32 %v757_v47, %v453_v44  ;;  %vm533_vm7 = vweird.f32 %v757_v47 }
 0x2d2   :  { %758 = vrsqrt.f32 %v447_v23  ;;  %vm534_vm10 = vmor %vm532_vm9, %vm533_vm7  ;;  %vm472_vm12 = vweird.f32 %v447_v23  ;;  %vm649_vm7 = vcmask 261120   ;;  %vm654_vm9 = vcmask 256000  }
 0x2d3   :  { %v528_v25 = vmul.f32 %v757_v47, %v527_v24 }
 0x2d5   :  { %v529_v26 = vmul.f32 0.5, %v528_v25  ;;  %v432_v27 = vpop.xlane.xlu2 %431 }
 0x2d6   :  { %v444_v28 = vmul.f32 %v432_v27, %v903_v30 }
 0x2d7   :  { %v530_v29 = vsub.f32 1.5, %v529_v26 }
 0x2d8   :  { %v759_v31 = vpop.eup %758  ;;  %v454_v32 = vadd.f32 1e-12, %v444_v28 }
 0x2d9   :  { %v467_v53 = vmul.f32 %v759_v31, %v447_v23  ;;  %v531_v34 = vmul.f32 %v757_v47, %v530_v29  ;;  %vm473_vm11 = vweird.f32 %v759_v31 }
 0x2da   :  { %760 = vrsqrt.f32 %v454_v32  ;;  %vm474_vm13 = vmor %vm472_vm12, %vm473_vm11  ;;  %vm542_vm15 = vweird.f32 %v454_v32 }
 0x2db   :  { %v468_v35 = vmul.f32 %v759_v31, %v467_v53  ;;  %v535_v36 = vsel %vm534_vm10, %v757_v47, %v531_v34 }
 0x2dc   :  { %v563_v37 = vmul.f32 %v535_v36, %v936_v58 }
 0x2dd   :  { %v469_v39 = vmul.f32 0.5, %v468_v35  ;;  %v414_v40 = vpop.xlane.xlu2 %413 }
 0x2de   :  { %v438_v41 = vmul.f32 %v414_v40, %v903_v30  ;;  %703 = vmatmul.msk.f32.gmra.mxu2 %vm338_vm6, %v563_v37 }
 0x2df   :  { %v470_v42 = vsub.f32 1.5, %v469_v39 }
 0x2e0   :  { %v761_v43 = vpop.eup %760  ;;  %v448_v45 = vadd.f32 1e-12, %v438_v41 }
 0x2e1   :  { %v537_v46 = vmul.f32 %v761_v43, %v454_v32  ;;  %v471_v48 = vmul.f32 %v759_v31, %v470_v42  ;;  %vm543_vm14 = vweird.f32 %v761_v43 }
 0x2e2   :  { %762 = vrsqrt.f32 %v448_v45  ;;  %vm544_vm0 = vmor %vm542_vm15, %vm543_vm14  ;;  %vm482_vm2 = vweird.f32 %v448_v45 }
 0x2e3   :  { %v538_v49 = vmul.f32 %v761_v43, %v537_v46  ;;  %v475_v50 = vsel %vm474_vm13, %v759_v31, %v471_v48 }
 0x2e4   :  { %v557_v51 = vmul.f32 %v475_v50, %v943_v63 }
 0x2e5   :  { %v539_v58 = vmul.f32 0.5, %v538_v49  ;;  %v435_v52 = vpop.xlane.xlu1 %434 }
 0x2e6   :  { %v445_v54 = vmul.f32 %v435_v52, %v903_v30  ;;  %697 = vmatmul.msk.f32.gmra.mxu0 %vm338_vm6, %v557_v51 }
 0x2e7   :  { %v540_v55 = vsub.f32 1.5, %v539_v58 }
 0x2e8   :  { %v763_v56 = vpop.eup %762  ;;  %v455_v57 = vadd.f32 1e-12, %v445_v54 }
 0x2e9   :  { %v477_v33 = vmul.f32 %v763_v56, %v448_v45  ;;  %v541_v59 = vmul.f32 %v761_v43, %v540_v55  ;;  %vm483_vm1 = vweird.f32 %v763_v56 }
 0x2ea   :  { %764 = vrsqrt.f32 %v455_v57  ;;  %vm484_vm3 = vmor %vm482_vm2, %vm483_vm1  ;;  %vm552_vm5 = vweird.f32 %v455_v57 }
 0x2eb   :  { %v478_v60 = vmul.f32 %v763_v56, %v477_v33  ;;  %v545_v61 = vsel %vm544_vm0, %v761_v43, %v541_v59 }
 0x2ec   :  { %v564_v62 = vmul.f32 %v545_v61, %v951_v8 }
 0x2ed   :  { %v479_v63 = vmul.f32 0.5, %v478_v60 }
 0x2ee   :  { %704 = vmatmul.msk.f32.gmra.mxu2 %vm338_vm6, %v564_v62 }
 0x2ef   :  { %v480_v0 = vsub.f32 1.5, %v479_v63 }
 0x2f0   :  { %v765_v30 = vpop.eup %764 }
 0x2f1   :  { %v547_v1 = vmul.f32 %v765_v30, %v455_v57  ;;  %v481_v2 = vmul.f32 %v763_v56, %v480_v0  ;;  %vm553_vm4 = vweird.f32 %v765_v30 }
 0x2f2   :  { %vm554_vm8 = vmor %vm552_vm5, %vm553_vm4 }
 0x2f3   :  { %v548_v3 = vmul.f32 %v765_v30, %v547_v1  ;;  %v485_v4 = vsel %vm484_vm3, %v763_v56, %v481_v2 }
 0x2f4   :  { %v558_v7 = vmul.f32 %v485_v4, %v956_v5 }
 0x2f5   :  { %v549_v9 = vmul.f32 0.5, %v548_v3 }
 0x2f6   :  { %698 = vmatmul.msk.f32.gmra.mxu0 %vm338_vm6, %v558_v7 }
 0x2f7   :  { %v550_v38 = vsub.f32 1.5, %v549_v9 }
 0x2f9   :  { %v551_v8 = vmul.f32 %v765_v30, %v550_v38 }
 0x2fb   :  { %v555_v10 = vsel %vm554_vm8, %v765_v30, %v551_v8 }
 0x2fc   :  { %v565_v11 = vmul.f32 %v555_v10, %v964_v15 }
 0x2fe   :  { %705 = vmatmul.msk.f32.gmra.mxu2 %vm338_vm6, %v565_v11 }
 0x334   :  { %v628_v12 = vpop.f32.mrf.mxu2 }
 0x335   :  { %v629_v5 = vadd.f32 %v743_v13, %v628_v12 }
 0x337   :  { %653 = vst.msk [vmem:[%s1053_s5 + $0x18] sm:$0xff] %vm649_vm7, %v629_v5 }
 0x33c   :  { %v631_v14 = vpop.f32.mrf.mxu2 }
 0x33d   :  { %v632_v16 = vadd.f32 %v743_v13, %v631_v14 }
 0x33f   :  { %655 = vst.msk [vmem:[%s1053_s5 + $0x20] sm:$0x7] %vm654_vm9, %v632_v16 }
 0x344   :  { %v619_v15 = vpop.f32.mrf.mxu0  ;;  %v634_v6 = vpop.f32.mrf.mxu2 }
 0x345   :  { %v620_v17 = vadd.f32 %v743_v13, %v619_v15  ;;  %v635_v44 = vadd.f32 %v743_v13, %v634_v6 }
 0x347   :  { %650 = vst.msk [vmem:[%s1053_s5] sm:$0xff] %vm649_vm7, %v620_v17 }
 0x348   :  { %656 = vst.msk [vmem:[%s1053_s5 + $0x28] sm:$0xff] %vm649_vm7, %v635_v44 }
 0x351   :  { %v637_v18 = vpop.f32.mrf.mxu2 }
 0x352   :  { %v638_v19 = vadd.f32 %v743_v13, %v637_v18 }
 0x354   :  { %657 = vst.msk [vmem:[%s1053_s5 + $0x30] sm:$0xff] %vm649_vm7, %v638_v19 }
 0x361   :  { %v640_v20 = vpop.f32.mrf.mxu2 }
 0x362   :  { %v641_v21 = vadd.f32 %v743_v13, %v640_v20 }
 0x363   :  { %v622_v22 = vpop.f32.mrf.mxu0 }
 0x364   :  { %658 = vst.msk [vmem:[%s1053_s5 + $0x38] sm:$0xff] %vm649_vm7, %v641_v21  ;;  %v623_v47 = vadd.f32 %v743_v13, %v622_v22 }
 0x366   :  { %651 = vst.msk [vmem:[%s1053_s5 + $0x8] sm:$0xff] %vm649_vm7, %v623_v47 }
 0x371   :  { %v643_v23 = vpop.f32.mrf.mxu2 }
 0x372   :  { %v644_v24 = vadd.f32 %v743_v13, %v643_v23 }
 0x373   :  { %v625_v25 = vpop.f32.mrf.mxu0 }
 0x374   :  { %659 = vst.msk [vmem:[%s1053_s5 + $0x40] sm:$0xff] %vm649_vm7, %v644_v24  ;;  %v626_v26 = vadd.f32 %v743_v13, %v625_v25 }
 0x376   :  { %652 = vst.msk [vmem:[%s1053_s5 + $0x10] sm:$0xff] %vm649_vm7, %v626_v26 }
 0x381   :  { %v646_v27 = vpop.f32.mrf.mxu2 }
 0x382   :  { %v647_v28 = vadd.f32 %v743_v13, %v646_v27 }
 0x384   :  { %660 = vst.msk [vmem:[%s1053_s5 + $0x48] sm:$0x7] %vm654_vm9, %v647_v28 }

</bundles_post_ra>
